<compile_context>
chip_gen: v7x
topology: tpu7x:2x2x1
jax: 0.10.0
libtpu: 0.0.40
codegen_flags: <defaults>
</compile_context>

<pallas_src>
import functools

import jax
import jax.numpy as jnp
from jax import lax
from jax.experimental import pallas as pl
from jax.experimental.pallas import tpu as pltpu


def topk_gating_kernel(x_ref, w_ref, b_ref, idx_ref, val_ref, *, top_k):
    """One batch tile of TopKGating in the transposed (experts, batch) layout."""
    x = x_ref[...]                       # (TB, D)  stream dtype (bf16/f32)
    w = w_ref[...]                       # (E, D)   stream dtype, resident
    b = b_ref[...]                       # (E, 1)   f32, resident

    # scores_T = W @ x^T + b -> (E, TB): contraction on the last dim of both
    # operands (standard trans_b MXU matmul, no materialized transpose of the
    # streamed x tile), f32 accumulation.
    scores = lax.dot_general(
        w, x,
        dimension_numbers=(((1,), (1,)), ((), ())),
        preferred_element_type=jnp.float32,
    ) + b                                                            # (E, TB)

    E, TB = scores.shape

    # Softmax statistics only (cheap sublane reductions over E experts).
    m = jnp.max(scores, axis=0, keepdims=True)                       # (1, TB)
    denom = jnp.sum(jnp.exp(scores - m), axis=0, keepdims=True)      # (1, TB)
    inv = pl.reciprocal(denom, approx=True)                          # EUP slot
    inv = inv * (2.0 - denom * inv)           # one Newton step -> ~1e-7 rel err

    row = lax.broadcasted_iota(jnp.int32, (E, TB), 0)    # expert id per sublane

    # Iterative top-k on the logits (softmax is monotonic -> identical order;
    # ties resolve to the lowest index, matching lax.top_k / torch.topk). Only
    # the selected values are normalized, the (E, TB) prob matrix never exists.
    cur = scores
    val_rows = []
    idx_rows = []
    for _ in range(top_k):
        mx = jnp.max(cur, axis=0, keepdims=True)                     # (1, TB)
        sel = jnp.min(jnp.where(cur == mx, row, E), axis=0, keepdims=True)
        val_rows.append(jnp.exp(mx - m) * inv)                       # (1, TB)
        idx_rows.append(sel)
        cur = jnp.where(row == sel, -jnp.inf, cur)                   # mask picked

    # Single lane-dense store per output ref per grid step.
    val_ref[...] = jnp.concatenate(val_rows, axis=0).astype(val_ref.dtype)
    idx_ref[...] = jnp.concatenate(idx_rows, axis=0).astype(jnp.int32)


def _round_down_to(v, m):
    return (v // m) * m


def topk_gating(x, weight, bias, top_k=2, *, block_b=None,
                stream_dtype=jnp.bfloat16, vmem_limit_bytes=None):
    """Returns (indices (B, top_k) int32, values (B, top_k) float32)."""
    B, D = x.shape
    E = weight.shape[0]
    stream_dtype = jnp.dtype(stream_dtype)
    itm = stream_dtype.itemsize

    # ---- batch-tile selection (device / D aware) ----------------------------
    if block_b is None:
        try:
            vmem_cap = pltpu.get_tpu_info().vmem_capacity_bytes   # 64 MiB on v7x
        except Exception:
            vmem_cap = 64 * 1024 * 1024                           # conservative
        budget = vmem_cap // 3 - 2 * E * D * itm    # leave room for resident W
        block_b = max(128, min(2048, budget // max(1, 2 * D * itm)))
    if block_b >= B:
        block_b = B                       # single tile: block dims == array dims
    else:
        # lane-dense (top_k, block_b) output tiles need block_b % 128 == 0
        block_b = max(128, _round_down_to(block_b, 128))
        # keep >= 4 grid steps so both v7x TensorCores get fed and the input
        # pipeline has depth
        if B // block_b < 4 and B // 4 >= 128:
            block_b = _round_down_to(B // 4, 128)
    grid = (pl.cdiv(B, block_b),)

    # ---- VMEM limit from actual footprint (+headroom, capped for v7x) -------
    if vmem_limit_bytes is None:
        footprint = (2 * block_b * D * itm           # x: double-buffered tiles
                     + 2 * E * D * itm               # gate weight (worst case 2x)
                     + 2 * E * 4                     # bias
                     + 2 * 2 * top_k * block_b * 4   # idx/val out, double-buffered
                     + 6 * E * block_b * 4)          # scores + top-k temporaries
        vmem_limit_bytes = min(56 * 1024 * 1024,
                               max(16 * 1024 * 1024, 2 * footprint))

    # ---- operands: stream x / W as bf16 (HBM-bound), bias + epilogue stay f32
    xs = x.astype(stream_dtype)
    ws = weight.astype(stream_dtype)
    b2 = bias.astype(jnp.float32).reshape(E, 1)      # (E,1): lane-broadcast layout

    cost = pl.CostEstimate(
        flops=2 * B * D * E,
        transcendentals=B * E,
        bytes_accessed=B * D * itm + E * D * itm + E * 4 + B * top_k * 8,
    )
    kernel = functools.partial(topk_gating_kernel, top_k=top_k)

    def _resident_spec(shape, single_buffer):
        if single_buffer:
            # Constant index_map => no double buffering needed; halves the
            # resident weight's VMEM footprint (matters under v7x's 64 MiB/TC).
            return pl.BlockSpec(shape, lambda i: (0, 0),
                                pipeline_mode=pl.Buffered(1))
        return pl.BlockSpec(shape, lambda i: (0, 0))

    def _call(single_buffer_residents):
        return pl.pallas_call(
            kernel,
            out_shape=(
                jax.ShapeDtypeStruct((top_k, B), jnp.int32),
                jax.ShapeDtypeStruct((top_k, B), jnp.float32),
            ),
            grid=grid,
            in_specs=[
                pl.BlockSpec((block_b, D), lambda i: (i, 0)),       # x: streamed
                _resident_spec((E, D), single_buffer_residents),    # W: resident
                _resident_spec((E, 1), single_buffer_residents),    # b: resident
            ],
            out_specs=(
                pl.BlockSpec((top_k, block_b), lambda i: (0, i)),   # lane-dense
                pl.BlockSpec((top_k, block_b), lambda i: (0, i)),
            ),
            compiler_params=pltpu.CompilerParams(
                dimension_semantics=("parallel",),   # shard batch grid across TCs
                vmem_limit_bytes=int(vmem_limit_bytes),
            ),
            cost_estimate=cost,
        )(xs, ws, b2)

    try:
        idx_t, val_t = _call(True)
    except Exception:
        # pl.Buffered(1) single-buffered resident blocks not supported by this
        # JAX/Mosaic version -> default double buffering (costs E*D*itm VMEM).
        idx_t, val_t = _call(False)

    # tiny (top_k, B) -> (B, top_k) transpose happens in the wrapper
    return idx_t.T, val_t.T


def topk_gating_ref(x, weight, bias, top_k=2, stream_dtype=jnp.float32):
    xs = x.astype(stream_dtype)
    ws = weight.astype(stream_dtype)
    scores = jnp.dot(xs, ws.T, preferred_element_type=jnp.float32) + bias[None, :]
    probs = jax.nn.softmax(scores, axis=1)
    vals, idxs = lax.top_k(probs, top_k)
    return idxs.astype(jnp.int32), vals


if __name__ == "__main__":
    # Small shapes consistent with the module: batch=8, input_dim=32, num_experts=8
    batch, input_dim, num_experts, top_k = 8, 32, 8, 2

    key = jax.random.PRNGKey(0)
    kx, kw, kb = jax.random.split(key, 3)

    x = jax.random.normal(kx, (batch, input_dim), dtype=jnp.float32)
    # deterministic nn.Linear-style init: U(-1/sqrt(D), 1/sqrt(D))
    bound = 1.0 / (input_dim ** 0.5)
    weight = jax.random.uniform(kw, (num_experts, input_dim),
                                minval=-bound, maxval=bound, dtype=jnp.float32)
    bias = jax.random.uniform(kb, (num_experts,),
                              minval=-bound, maxval=bound, dtype=jnp.float32)

    # 1) exact-semantics f32 path (matches the PyTorch module numerics)
    idx32, val32 = topk_gating(x, weight, bias, top_k=top_k,
                               stream_dtype=jnp.float32)
    jax.block_until_ready((idx32, val32))
    ref_idx, ref_val = topk_gating_ref(x, weight, bias, top_k=top_k)
    assert jnp.array_equal(idx32, ref_idx), "f32 top-k indices mismatch"
    assert jnp.allclose(val32, ref_val, atol=1e-5), "f32 top-k values mismatch"

    # 2) default bf16-streaming path (HBM-bound => ~2x faster); compare against
    #    a reference using the same bf16 matmul numerics, plus a loose check
    #    against the exact f32 reference.
    idx_bf, val_bf = topk_gating(x, weight, bias, top_k=top_k)
    jax.block_until_ready((idx_bf, val_bf))
    ref_idx_bf, ref_val_bf = topk_gating_ref(x, weight, bias, top_k=top_k,
                                             stream_dtype=jnp.bfloat16)
    assert jnp.array_equal(idx_bf, ref_idx_bf), "bf16 top-k indices mismatch"
    assert jnp.allclose(val_bf, ref_val_bf, atol=1e-4), "bf16 top-k values mismatch"
    assert jnp.allclose(val_bf, ref_val, atol=5e-3), "bf16 values drifted from f32 ref"

    print("KERNEL_OK")
</pallas_src>

<mosaic_0001>
module attributes {stable_mosaic.version = 11 : i64} {
  func.func @topk_gating_kernel(%arg0: i32, %arg1: memref<8x32xf32, #tpu.memory_space<vmem>>, %arg2: memref<8x32xf32, #tpu.memory_space<vmem>>, %arg3: memref<8x1xf32, #tpu.memory_space<vmem>>, %arg4: memref<2x8xi32, #tpu.memory_space<vmem>>, %arg5: memref<2x8xf32, #tpu.memory_space<vmem>>) attributes {dimension_semantics = [#tpu.dimension_semantics<parallel>], iteration_bounds = array<i64: 1>, scalar_prefetch = 0 : i64, scratch_operands = 0 : i64, tpu.core_type = #tpu.core_type<tc>, window_params = [{transform_indices = @transform_0, window_bounds = array<i64: 8, 32>}, {pipeline_mode = #tpu.pipeline_mode<synchronous>, transform_indices = @transform_1, window_bounds = array<i64: 8, 32>}, {pipeline_mode = #tpu.pipeline_mode<synchronous>, transform_indices = @transform_2, window_bounds = array<i64: 8, 1>}, {transform_indices = @transform_3, window_bounds = array<i64: 2, 8>}, {transform_indices = @transform_4, window_bounds = array<i64: 2, 8>}]} {
    %c0 = arith.constant 0 : index
    %c0_0 = arith.constant 0 : index
    %0 = vector.load %arg1[%c0, %c0_0] : memref<8x32xf32, #tpu.memory_space<vmem>>, vector<8x32xf32>
    %c0_1 = arith.constant 0 : index
    %c0_2 = arith.constant 0 : index
    %1 = vector.load %arg2[%c0_1, %c0_2] : memref<8x32xf32, #tpu.memory_space<vmem>>, vector<8x32xf32>
    %c0_3 = arith.constant 0 : index
    %c0_4 = arith.constant 0 : index
    %2 = vector.load %arg3[%c0_3, %c0_4] : memref<8x1xf32, #tpu.memory_space<vmem>>, vector<8x1xf32>
    %cst = arith.constant dense<0.000000e+00> : vector<8x8xf32>
    %3 = tpu.matmul %1, %0, %cst {dimension_numbers = #tpu.dot_dimension_numbers<[1], [1], [0], [0], [0, 0, 1, 0], [], []>} : vector<8x32xf32>, vector<8x32xf32>, vector<8x8xf32> -> vector<8x8xf32>
    %4 = vector.broadcast %2 : vector<8x1xf32> to vector<8x8xf32>
    %5 = arith.addf %3, %4 : vector<8x8xf32>
    %cst_5 = arith.constant dense<0xFF800000> : vector<8xf32>
    %6 = vector.multi_reduction <maximumf>, %5, %cst_5 [0] : vector<8x8xf32> to vector<8xf32>
    %7 = vector.shape_cast %6 : vector<8xf32> to vector<1x8xf32>
    %8 = vector.broadcast %7 : vector<1x8xf32> to vector<8x8xf32>
    %9 = arith.subf %5, %8 : vector<8x8xf32>
    %10 = math.exp %9 : vector<8x8xf32>
    %cst_6 = arith.constant dense<0.000000e+00> : vector<8xf32>
    %11 = vector.multi_reduction <add>, %10, %cst_6 [0] : vector<8x8xf32> to vector<8xf32>
    %12 = vector.shape_cast %11 : vector<8xf32> to vector<1x8xf32>
    %13 = tpu.reciprocal %12 {approx = true} : vector<1x8xf32> -> vector<1x8xf32>
    %14 = arith.mulf %12, %13 : vector<1x8xf32>
    %cst_7 = arith.constant 2.000000e+00 : f32
    %15 = vector.broadcast %cst_7 : f32 to vector<1x8xf32>
    %16 = arith.subf %15, %14 : vector<1x8xf32>
    %17 = arith.mulf %13, %16 : vector<1x8xf32>
    %18 = tpu.iota {dimensions = array<i32: 0>} : vector<8x8xi32>
    %cst_8 = arith.constant dense<0xFF800000> : vector<8xf32>
    %19 = vector.multi_reduction <maximumf>, %5, %cst_8 [0] : vector<8x8xf32> to vector<8xf32>
    %20 = vector.shape_cast %19 : vector<8xf32> to vector<1x8xf32>
    %21 = vector.broadcast %20 : vector<1x8xf32> to vector<8x8xf32>
    %22 = arith.cmpf oeq, %5, %21 : vector<8x8xf32>
    %c8_i32 = arith.constant 8 : i32
    %23 = vector.broadcast %c8_i32 : i32 to vector<8x8xi32>
    %24 = arith.select %22, %18, %23 : vector<8x8xi1>, vector<8x8xi32>
    %cst_9 = arith.constant dense<2147483647> : vector<8xi32>
    %25 = vector.multi_reduction <minsi>, %24, %cst_9 [0] : vector<8x8xi32> to vector<8xi32>
    %26 = vector.shape_cast %25 : vector<8xi32> to vector<1x8xi32>
    %27 = arith.subf %20, %7 : vector<1x8xf32>
    %28 = math.exp %27 : vector<1x8xf32>
    %29 = arith.mulf %28, %17 : vector<1x8xf32>
    %30 = vector.broadcast %26 : vector<1x8xi32> to vector<8x8xi32>
    %31 = arith.cmpi eq, %18, %30 : vector<8x8xi32>
    %cst_10 = arith.constant 0xFF800000 : f32
    %32 = vector.broadcast %cst_10 : f32 to vector<8x8xf32>
    %33 = arith.select %31, %32, %5 : vector<8x8xi1>, vector<8x8xf32>
    %cst_11 = arith.constant dense<0xFF800000> : vector<8xf32>
    %34 = vector.multi_reduction <maximumf>, %33, %cst_11 [0] : vector<8x8xf32> to vector<8xf32>
    %35 = vector.shape_cast %34 : vector<8xf32> to vector<1x8xf32>
    %36 = vector.broadcast %35 : vector<1x8xf32> to vector<8x8xf32>
    %37 = arith.cmpf oeq, %33, %36 : vector<8x8xf32>
    %c8_i32_12 = arith.constant 8 : i32
    %38 = vector.broadcast %c8_i32_12 : i32 to vector<8x8xi32>
    %39 = arith.select %37, %18, %38 : vector<8x8xi1>, vector<8x8xi32>
    %cst_13 = arith.constant dense<2147483647> : vector<8xi32>
    %40 = vector.multi_reduction <minsi>, %39, %cst_13 [0] : vector<8x8xi32> to vector<8xi32>
    %41 = vector.shape_cast %40 : vector<8xi32> to vector<1x8xi32>
    %42 = arith.subf %35, %7 : vector<1x8xf32>
    %43 = math.exp %42 : vector<1x8xf32>
    %44 = arith.mulf %43, %17 : vector<1x8xf32>
    %45 = tpu.concatenate %29, %44 in 0 : vector<1x8xf32>, vector<1x8xf32> -> vector<2x8xf32>
    %c0_14 = arith.constant 0 : index
    %c0_15 = arith.constant 0 : index
    %46 = vector.load %arg5[%c0_14, %c0_15] : memref<2x8xf32, #tpu.memory_space<vmem>>, vector<2x8xf32>
    tpu.vector_store %arg5[%c0_14, %c0_15], %45 {strides = array<i32>} : memref<2x8xf32, #tpu.memory_space<vmem>>, vector<2x8xf32>,
    %47 = tpu.concatenate %26, %41 in 0 : vector<1x8xi32>, vector<1x8xi32> -> vector<2x8xi32>
    %c0_16 = arith.constant 0 : index
    %c0_17 = arith.constant 0 : index
    %48 = vector.load %arg4[%c0_16, %c0_17] : memref<2x8xi32, #tpu.memory_space<vmem>>, vector<2x8xi32>
    tpu.vector_store %arg4[%c0_16, %c0_17], %47 {strides = array<i32>} : memref<2x8xi32, #tpu.memory_space<vmem>>, vector<2x8xi32>,
    return
  }
  func.func @transform_0(%arg0: i32) -> (i32, i32) {
    %c0_i32 = arith.constant 0 : i32
    %c0_i32_0 = arith.constant 0 : i32
    return %arg0, %c0_i32 : i32, i32
  }
  func.func @transform_1(%arg0: i32) -> (i32, i32) {
    %c0_i32 = arith.constant 0 : i32
    %c0_i32_0 = arith.constant 0 : i32
    %c0_i32_1 = arith.constant 0 : i32
    return %c0_i32, %c0_i32_0 : i32, i32
  }
  func.func @transform_2(%arg0: i32) -> (i32, i32) {
    %c0_i32 = arith.constant 0 : i32
    %c0_i32_0 = arith.constant 0 : i32
    %c0_i32_1 = arith.constant 0 : i32
    return %c0_i32, %c0_i32_0 : i32, i32
  }
  func.func @transform_3(%arg0: i32) -> (i32, i32) {
    %c0_i32 = arith.constant 0 : i32
    %c0_i32_0 = arith.constant 0 : i32
    return %c0_i32, %arg0 : i32, i32
  }
  func.func @transform_4(%arg0: i32) -> (i32, i32) {
    %c0_i32 = arith.constant 0 : i32
    %c0_i32_0 = arith.constant 0 : i32
    return %c0_i32, %arg0 : i32, i32
  }
}

module attributes {stable_mosaic.version = 11 : i64} {
  func.func @topk_gating_kernel(%arg0: i32, %arg1: memref<8x32xf32, #tpu.memory_space<vmem>>, %arg2: memref<8x32xf32, #tpu.memory_space<vmem>>, %arg3: memref<8x1xf32, #tpu.memory_space<vmem>>, %arg4: memref<2x8xi32, #tpu.memory_space<vmem>>, %arg5: memref<2x8xf32, #tpu.memory_space<vmem>>) attributes {dimension_semantics = [#tpu.dimension_semantics<parallel>], iteration_bounds = array<i64: 1>, scalar_prefetch = 0 : i64, scratch_operands = 0 : i64, tpu.core_type = #tpu.core_type<tc>, window_params = [{transform_indices = @transform_0, window_bounds = array<i64: 8, 32>}, {pipeline_mode = #tpu.pipeline_mode<synchronous>, transform_indices = @transform_1, window_bounds = array<i64: 8, 32>}, {pipeline_mode = #tpu.pipeline_mode<synchronous>, transform_indices = @transform_2, window_bounds = array<i64: 8, 1>}, {transform_indices = @transform_3, window_bounds = array<i64: 2, 8>}, {transform_indices = @transform_4, window_bounds = array<i64: 2, 8>}]} {
    %c0 = arith.constant 0 : index
    %c0_0 = arith.constant 0 : index
    %0 = vector.load %arg1[%c0, %c0_0] : memref<8x32xf32, #tpu.memory_space<vmem>>, vector<8x32xf32>
    %c0_1 = arith.constant 0 : index
    %c0_2 = arith.constant 0 : index
    %1 = vector.load %arg2[%c0_1, %c0_2] : memref<8x32xf32, #tpu.memory_space<vmem>>, vector<8x32xf32>
    %c0_3 = arith.constant 0 : index
    %c0_4 = arith.constant 0 : index
    %2 = vector.load %arg3[%c0_3, %c0_4] : memref<8x1xf32, #tpu.memory_space<vmem>>, vector<8x1xf32>
    %cst = arith.constant dense<0.000000e+00> : vector<8x8xf32>
    %3 = tpu.matmul %1, %0, %cst {dimension_numbers = #tpu.dot_dimension_numbers<[1], [1], [0], [0], [0, 0, 1, 0], [], []>} : vector<8x32xf32>, vector<8x32xf32>, vector<8x8xf32> -> vector<8x8xf32>
    %4 = vector.broadcast %2 : vector<8x1xf32> to vector<8x8xf32>
    %5 = arith.addf %3, %4 : vector<8x8xf32>
    %cst_5 = arith.constant dense<0xFF800000> : vector<8xf32>
    %6 = vector.multi_reduction <maximumf>, %5, %cst_5 [0] : vector<8x8xf32> to vector<8xf32>
    %7 = vector.shape_cast %6 : vector<8xf32> to vector<1x8xf32>
    %8 = vector.broadcast %7 : vector<1x8xf32> to vector<8x8xf32>
    %9 = arith.subf %5, %8 : vector<8x8xf32>
    %10 = math.exp %9 : vector<8x8xf32>
    %cst_6 = arith.constant dense<0.000000e+00> : vector<8xf32>
    %11 = vector.multi_reduction <add>, %10, %cst_6 [0] : vector<8x8xf32> to vector<8xf32>
    %12 = vector.shape_cast %11 : vector<8xf32> to vector<1x8xf32>
    %13 = tpu.reciprocal %12 {approx = true} : vector<1x8xf32> -> vector<1x8xf32>
    %14 = arith.mulf %12, %13 : vector<1x8xf32>
    %cst_7 = arith.constant 2.000000e+00 : f32
    %15 = vector.broadcast %cst_7 : f32 to vector<1x8xf32>
    %16 = arith.subf %15, %14 : vector<1x8xf32>
    %17 = arith.mulf %13, %16 : vector<1x8xf32>
    %18 = tpu.iota {dimensions = array<i32: 0>} : vector<8x8xi32>
    %cst_8 = arith.constant dense<0xFF800000> : vector<8xf32>
    %19 = vector.multi_reduction <maximumf>, %5, %cst_8 [0] : vector<8x8xf32> to vector<8xf32>
    %20 = vector.shape_cast %19 : vector<8xf32> to vector<1x8xf32>
    %21 = vector.broadcast %20 : vector<1x8xf32> to vector<8x8xf32>
    %22 = arith.cmpf oeq, %5, %21 : vector<8x8xf32>
    %c8_i32 = arith.constant 8 : i32
    %23 = vector.broadcast %c8_i32 : i32 to vector<8x8xi32>
    %24 = arith.select %22, %18, %23 : vector<8x8xi1>, vector<8x8xi32>
    %cst_9 = arith.constant dense<2147483647> : vector<8xi32>
    %25 = vector.multi_reduction <minsi>, %24, %cst_9 [0] : vector<8x8xi32> to vector<8xi32>
    %26 = vector.shape_cast %25 : vector<8xi32> to vector<1x8xi32>
    %27 = arith.subf %20, %7 : vector<1x8xf32>
    %28 = math.exp %27 : vector<1x8xf32>
    %29 = arith.mulf %28, %17 : vector<1x8xf32>
    %30 = vector.broadcast %26 : vector<1x8xi32> to vector<8x8xi32>
    %31 = arith.cmpi eq, %18, %30 : vector<8x8xi32>
    %cst_10 = arith.constant 0xFF800000 : f32
    %32 = vector.broadcast %cst_10 : f32 to vector<8x8xf32>
    %33 = arith.select %31, %32, %5 : vector<8x8xi1>, vector<8x8xf32>
    %cst_11 = arith.constant dense<0xFF800000> : vector<8xf32>
    %34 = vector.multi_reduction <maximumf>, %33, %cst_11 [0] : vector<8x8xf32> to vector<8xf32>
    %35 = vector.shape_cast %34 : vector<8xf32> to vector<1x8xf32>
    %36 = vector.broadcast %35 : vector<1x8xf32> to vector<8x8xf32>
    %37 = arith.cmpf oeq, %33, %36 : vector<8x8xf32>
    %c8_i32_12 = arith.constant 8 : i32
    %38 = vector.broadcast %c8_i32_12 : i32 to vector<8x8xi32>
    %39 = arith.select %37, %18, %38 : vector<8x8xi1>, vector<8x8xi32>
    %cst_13 = arith.constant dense<2147483647> : vector<8xi32>
    %40 = vector.multi_reduction <minsi>, %39, %cst_13 [0] : vector<8x8xi32> to vector<8xi32>
    %41 = vector.shape_cast %40 : vector<8xi32> to vector<1x8xi32>
    %42 = arith.subf %35, %7 : vector<1x8xf32>
    %43 = math.exp %42 : vector<1x8xf32>
    %44 = arith.mulf %43, %17 : vector<1x8xf32>
    %45 = tpu.concatenate %29, %44 in 0 : vector<1x8xf32>, vector<1x8xf32> -> vector<2x8xf32>
    %c0_14 = arith.constant 0 : index
    %c0_15 = arith.constant 0 : index
    %46 = vector.load %arg5[%c0_14, %c0_15] : memref<2x8xf32, #tpu.memory_space<vmem>>, vector<2x8xf32>
    tpu.vector_store %arg5[%c0_14, %c0_15], %45 {strides = array<i32>} : memref<2x8xf32, #tpu.memory_space<vmem>>, vector<2x8xf32>,
    %47 = tpu.concatenate %26, %41 in 0 : vector<1x8xi32>, vector<1x8xi32> -> vector<2x8xi32>
    %c0_16 = arith.constant 0 : index
    %c0_17 = arith.constant 0 : index
    %48 = vector.load %arg4[%c0_16, %c0_17] : memref<2x8xi32, #tpu.memory_space<vmem>>, vector<2x8xi32>
    tpu.vector_store %arg4[%c0_16, %c0_17], %47 {strides = array<i32>} : memref<2x8xi32, #tpu.memory_space<vmem>>, vector<2x8xi32>,
    return
  }
  func.func @transform_0(%arg0: i32) -> (i32, i32) {
    %c0_i32 = arith.constant 0 : i32
    %c0_i32_0 = arith.constant 0 : i32
    return %arg0, %c0_i32 : i32, i32
  }
  func.func @transform_1(%arg0: i32) -> (i32, i32) {
    %c0_i32 = arith.constant 0 : i32
    %c0_i32_0 = arith.constant 0 : i32
    %c0_i32_1 = arith.constant 0 : i32
    return %c0_i32, %c0_i32_0 : i32, i32
  }
  func.func @transform_2(%arg0: i32) -> (i32, i32) {
    %c0_i32 = arith.constant 0 : i32
    %c0_i32_0 = arith.constant 0 : i32
    %c0_i32_1 = arith.constant 0 : i32
    return %c0_i32, %c0_i32_0 : i32, i32
  }
  func.func @transform_3(%arg0: i32) -> (i32, i32) {
    %c0_i32 = arith.constant 0 : i32
    %c0_i32_0 = arith.constant 0 : i32
    return %c0_i32, %arg0 : i32, i32
  }
  func.func @transform_4(%arg0: i32) -> (i32, i32) {
    %c0_i32 = arith.constant 0 : i32
    %c0_i32_0 = arith.constant 0 : i32
    return %c0_i32, %arg0 : i32, i32
  }
}

</mosaic_0001>

<bundles_post_ra>
// kernel: tpu_custom_call.1
= control target key start
LH: loop header
LB: loop body
LE: loop exit
PB: predicated region body
PF: predicated region fallthrough
CT: control target
= control target key end

     0   :  { %10 = vsyncpa [#allocation3], 0  ;;  %s393_s0 = inlined_call_operand.vmem [shape: f32[8,32], index: 0, kind: input, shape index: {}]   ;;  %s394_s1 = inlined_call_operand.hbm [shape: f32[8,32], index: 1, kind: input, shape index: {}]   ;;  %s395_s2 = inlined_call_operand.vmem [shape: f32[8,1], index: 2, kind: input, shape index: {}]   ;;  %s396_s3 = inlined_call_operand.hbm [shape: s32[2,8], index: 3, kind: output, shape index: {0}]   ;;  %s397_s4 = inlined_call_operand.hbm [shape: f32[2,8], index: 4, kind: output, shape index: {1}]  }
   0x1   :  { %11 = vsyncpa [#allocation4], 0 }
   0x2   :  { %12 = vsyncpa [#allocation7], 0  ;;  %s311_s15 = smov [#allocation2]   ;;  %s239_s19 = scalar_lea.hbm %s394_s1, 128 }
   0x3   :  { %s21_s16 = sshll.u32 %s311_s15, 4  ;;  %p240_p0 = scmp.ne.s32.totalorder %s394_s1, %s239_s19  ;;  %s22_s16 = int_to_ptr.vmem [resolvable:$true] %s21_s16 }
   0x4   :  { %p243_p1 = scmp.lt.u32.totalorder %s239_s19, %s394_s1 }
   0x6   :  { %p245_p2 = pnand %p243_p1, %p240_p0 }
   0x8   :  { %248 = shalt.err (!%p245_p2)
}
   0x9   :  { %s249_s24 = scalar_lea.vmem %s22_s16, 128  ;;  %p254_p4 = scmp.lt.s32.totalorder %s22_s16, %s22_s16 }
   0xa   :  { %p250_p3 = scmp.ne.s32.totalorder %s22_s16, %s249_s24  ;;  %p255_p5 = scmp.lt.s32.totalorder %s249_s24, %s249_s24 }
   0xc   :  { %p256_p6 = por %p255_p5, %p254_p4 }
   0xe   :  { %p257_p7 = pnand %p256_p6, %p250_p3 }
  0x10   :  { %260 = shalt.err (!%p257_p7)
}
  0x11   :  { %24 = dma.hbm_to_vmem [thread:$0]  %s394_s1, 128, %s22_s16, [#allocation3]  }
  0x12   :  { %305 = dma.done.wait [#allocation3], 128  }
  0x13   :  { %306 = vsyncadd [#allocation3], 4294967168  ;;  %v312_v0 = vmov 0.0   ;;  %vm313_vm0 = vmmov 0   ;;  %v314_v1 = vmov 0   ;;  %vm38_vm1 = vcmask 261120  }
  0x14   :  { %219 = vmatprep.subr.mxu0 %v312_v0  ;;  %221 = vmatprep.mubr.msk.f32.mxu0 %vm313_vm0, %v312_v0  ;;  %v30_v2 = vld [vmem:[%s393_s0] sm:$0xff]  ;;  %vm115_vm2 = vcmask 64512   ;;  %v137_v13 = vlaneseq  ;;  %s315_s0 = smov [#allocation5]   ;;  %vm180_vm11 = vcmask 1040384   ;;  %vm182_vm13 = vcmask 58368  }
  0x15   :  { %230 = vset.pattern.permute.xlu0 %v314_v1  ;;  %v32_v3 = vld [vmem:[%s395_s2] sm:$0xff]  ;;  %220 = vmatpush3.xpose.msk.msra.mxu0 %vm38_vm1, %v30_v2  ;;  %s192_s1 = sshll.u32 %s315_s0, 4  ;;  %s316_s2 = smov [#allocation6]   ;;  %s193_s1 = int_to_ptr.vmem [resolvable:$true] %s192_s1 }
  0x16   :  { %v31_v4 = vld [vmem:[#allocation2] sm:$0xff]  ;;  %35 = vperm.xlu0 %230, %v32_v3   ;;  %v138_v16 = vshrl.u32 %v137_v13, 7  ;;  %s202_s5 = sshll.u32 %s316_s2, 4  ;;  %s261_s6 = scalar_lea.vmem %s193_s1, 32  ;;  %s203_s5 = int_to_ptr.vmem [resolvable:$true] %s202_s5 }
  0x17   :  { %p262_p8 = scmp.ne.s32.totalorder %s193_s1, %s261_s6  ;;  %p266_p9 = scmp.lt.s32.totalorder %s193_s1, %s193_s1 }
  0x18   :  { %222 = vmatmul.mubr.msk.f32.vlgmr.msra.gmra.mrb[0].mxu0 %vm38_vm1, %v31_v4  ;;  %p267_p10 = scmp.lt.s32.totalorder %s261_s6, %s261_s6 }
  0x1a   :  { %p268_p11 = por %p267_p10, %p266_p9 }
  0x1c   :  { %p269_p12 = pnand %p268_p11, %p262_p8 }
  0x95   :  { %v36_v5 = vpop.permute.xlu0 %35 }
  0xeb   :  { %v111_v6 = vpop.f32.mrb[0].mxu0 }
  0xec   :  { %v112_v7 = vadd.f32 %v111_v6, %v36_v5  ;;  %v223_v8 = vpop.f32.mrb[1].mxu0 }
  0xee   :  { %v116_v9 = vsel %vm115_vm2, %v112_v7, -inf }
  0xef   :  { %v117_v10 = vrot.slane %v116_v9, 4 }
  0xf1   :  { %v118_v11 = vmax.f32 %v116_v9, %v117_v10 }
  0xf3   :  { %v119_v12 = vrot.slane %v118_v11, 2 }
  0xf5   :  { %v120_v14 = vmax.f32 %v118_v11, %v119_v12 }
  0xf7   :  { %v121_v15 = vrot.slane %v120_v14, 1 }
  0xf9   :  { %v122_v17 = vmax.f32 %v120_v14, %v121_v15 }
  0xfb   :  { %v123_v18 = vsub.f32 %v112_v7, %v122_v17  ;;  %vm139_vm3 = vcmp.eq.f32.partialorder %v112_v7, %v122_v17  ;;  %v151_v41 = vsub.f32 %v122_v17, %v122_v17 }
  0xfc   :  { %v140_v19 = vsel %vm139_vm3, %v138_v16, 8 }
  0xfd   :  { %v124_v20 = vmul.f32 1.442695, %v123_v18  ;;  %v141_v21 = vsel %vm115_vm2, %v140_v19, 2147483647  ;;  %v152_v45 = vmul.f32 1.442695, %v151_v41 }
  0xfe   :  { %v142_v22 = vrot.slane %v141_v21, 4 }
  0xff   :  { %231 = vpow2.f32 %v124_v20 }
 0x100   :  { %vm143_vm4 = vcmp.lt.s32.totalorder %v141_v21, %v142_v22 }
 0x101   :  { %v144_v23 = vsel %vm143_vm4, %v141_v21, %v142_v22 }
 0x102   :  { %v145_v24 = vrot.slane %v144_v23, 2 }
 0x104   :  { %vm146_vm5 = vcmp.lt.s32.totalorder %v144_v23, %v145_v24 }
 0x105   :  { %v147_v25 = vsel %vm146_vm5, %v144_v23, %v145_v24 }
 0x106   :  { %v148_v26 = vrot.slane %v147_v25, 1 }
 0x108   :  { %vm149_vm6 = vcmp.lt.s32.totalorder %v147_v25, %v148_v26 }
 0x109   :  { %v232_v27 = vpop.eup %231  ;;  %v150_v28 = vsel %vm149_vm6, %v147_v25, %v148_v26 }
 0x10a   :  { %vm155_vm7 = vcmp.eq.s32.totalorder %v138_v16, %v150_v28  ;;  %v126_v29 = vsel %vm115_vm2, %v232_v27, 0.0 }
 0x10b   :  { %v156_v30 = vsel %vm155_vm7, -inf, %v112_v7  ;;  %v127_v31 = vrot.slane %v126_v29, 4 }
 0x10c   :  { %v157_v32 = vsel %vm115_vm2, %v156_v30, -inf }
 0x10d   :  { %v158_v33 = vrot.slane %v157_v32, 4  ;;  %v128_v34 = vadd.f32 %v127_v31, %v126_v29 }
 0x10f   :  { %v159_v35 = vmax.f32 %v157_v32, %v158_v33  ;;  %v129_v36 = vrot.slane %v128_v34, 2 }
 0x111   :  { %v160_v37 = vrot.slane %v159_v35, 2  ;;  %v130_v38 = vadd.f32 %v129_v36, %v128_v34 }
 0x113   :  { %v161_v39 = vmax.f32 %v159_v35, %v160_v37  ;;  %v131_v40 = vrot.slane %v130_v38, 1 }
 0x115   :  { %v162_v42 = vrot.slane %v161_v39, 1  ;;  %v132_v43 = vadd.f32 %v131_v40, %v130_v38 }
 0x117   :  { %v163_v44 = vmax.f32 %v161_v39, %v162_v42  ;;  %233 = vrcp.f32 %v132_v43 }
 0x118   :  { %235 = vpow2.f32 %v152_v45 }
 0x119   :  { %vm164_vm8 = vcmp.eq.f32.partialorder %v156_v30, %v163_v44  ;;  %v176_v46 = vsub.f32 %v163_v44, %v122_v17 }
 0x11a   :  { %v165_v47 = vsel %vm164_vm8, %v138_v16, 8 }
 0x11b   :  { %v166_v48 = vsel %vm115_vm2, %v165_v47, 2147483647  ;;  %v177_v49 = vmul.f32 1.442695, %v176_v46 }
 0x11c   :  { %v167_v50 = vrot.slane %v166_v48, 4 }
 0x11d   :  { %237 = vpow2.f32 %v177_v49 }
 0x11e   :  { %vm168_vm9 = vcmp.lt.s32.totalorder %v166_v48, %v167_v50 }
 0x11f   :  { %v169_v51 = vsel %vm168_vm9, %v166_v48, %v167_v50 }
 0x120   :  { %v170_v52 = vrot.slane %v169_v51, 2 }
 0x121   :  { %v234_v53 = vpop.eup %233 }
 0x122   :  { %vm171_vm10 = vcmp.lt.s32.totalorder %v169_v51, %v170_v52  ;;  %v134_v54 = vmul.f32 %v234_v53, %v132_v43  ;;  %v236_v58 = vpop.eup %235 }
 0x123   :  { %v172_v55 = vsel %vm171_vm10, %v169_v51, %v170_v52 }
 0x124   :  { %v173_v56 = vrot.slane %v172_v55, 1  ;;  %v135_v57 = vsub.f32 2.0, %v134_v54 }
 0x126   :  { %vm174_vm12 = vcmp.lt.s32.totalorder %v172_v55, %v173_v56  ;;  %v136_v59 = vmul.f32 %v234_v53, %v135_v57 }
 0x127   :  { %v238_v60 = vpop.eup %237  ;;  %v175_v61 = vsel %vm174_vm12, %v172_v55, %v173_v56 }
 0x128   :  { %v184_v62 = vsel %vm180_vm11, %v150_v28, %v175_v61  ;;  %v154_v63 = vmul.f32 %v236_v58, %v136_v59  ;;  %v179_v0 = vmul.f32 %v238_v60, %v136_v59 }
 0x129   :  { %185 = vst.msk [vmem:[#allocation5] sm:$0x3] %vm182_vm13, %v184_v62 }
 0x12a   :  { %272 = shalt.err (!%p269_p12)
}
 0x12b   :  { %s273_s9 = scalar_lea.hbm %s396_s3, 32 }
 0x12c   :  { %p274_p13 = scmp.ne.s32.totalorder %s396_s3, %s273_s9  ;;  %p277_p0 = scmp.lt.u32.totalorder %s273_s9, %s396_s3 }
 0x12e   :  { %p279_p1 = pnand %p277_p0, %p274_p13 }
 0x130   :  { %282 = shalt.err (!%p279_p1)
}
 0x131   :  { %195 = dma.vmem_to_hbm [thread:$0]  %s193_s1, 32, %s396_s3, [#allocation4]   ;;  %v181_v1 = vsel %vm180_vm11, %v154_v63, %v179_v0 }
 0x132   :  { %183 = vst.msk [vmem:[#allocation6] sm:$0x3] %vm182_vm13, %v181_v1  ;;  %s283_s16 = scalar_lea.vmem %s203_s5, 32  ;;  %p288_p3 = scmp.lt.s32.totalorder %s203_s5, %s203_s5 }
 0x133   :  { %p284_p2 = scmp.ne.s32.totalorder %s203_s5, %s283_s16  ;;  %p289_p4 = scmp.lt.s32.totalorder %s283_s16, %s283_s16 }
 0x135   :  { %p290_p5 = por %p289_p4, %p288_p3 }
 0x137   :  { %p291_p6 = pnand %p290_p5, %p284_p2 }
 0x139   :  { %294 = shalt.err (!%p291_p6)
}
 0x13a   :  { %s295_s19 = scalar_lea.hbm %s397_s4, 32 }
 0x13b   :  { %p296_p7 = scmp.ne.s32.totalorder %s397_s4, %s295_s19  ;;  %p299_p8 = scmp.lt.u32.totalorder %s295_s19, %s397_s4 }
 0x13d   :  { %p301_p9 = pnand %p299_p8, %p296_p7 }
 0x13f   :  { %304 = shalt.err (!%p301_p9)
}
 0x140   :  { %205 = dma.vmem_to_hbm [thread:$0]  %s203_s5, 32, %s397_s4, [#allocation7]  }
 0x141   :  { %307 = dma.done.wait [#allocation4], 32  }
 0x142   :  { %308 = vsyncadd [#allocation4], 4294967264 }
 0x143   :  { %309 = dma.done.wait [#allocation7], 32  }
 0x144   :  { %310 = vsyncadd [#allocation7], 4294967264 }
 0x145   :  { %212 = vsyncpa [#allocation3], 1 }
 0x146   :  { %213 = vsyncpa [#allocation4], 1 }
 0x147   :  { %214 = vsyncpa [#allocation7], 1 }

// kernel: tpu_custom_call.1
= control target key start
LH: loop header
LB: loop body
LE: loop exit
PB: predicated region body
PF: predicated region fallthrough
CT: control target
= control target key end

     0   :  { %10 = vsyncpa [#allocation3], 0  ;;  %s393_s0 = inlined_call_operand.vmem [shape: f32[8,32], index: 0, kind: input, shape index: {}]   ;;  %s394_s1 = inlined_call_operand.hbm [shape: f32[8,32], index: 1, kind: input, shape index: {}]   ;;  %s395_s2 = inlined_call_operand.vmem [shape: f32[8,1], index: 2, kind: input, shape index: {}]   ;;  %s396_s3 = inlined_call_operand.hbm [shape: s32[2,8], index: 3, kind: output, shape index: {0}]   ;;  %s397_s4 = inlined_call_operand.hbm [shape: f32[2,8], index: 4, kind: output, shape index: {1}]  }
   0x1   :  { %11 = vsyncpa [#allocation4], 0 }
   0x2   :  { %12 = vsyncpa [#allocation7], 0  ;;  %s311_s15 = smov [#allocation2]   ;;  %s239_s19 = scalar_lea.hbm %s394_s1, 128 }
   0x3   :  { %s21_s16 = sshll.u32 %s311_s15, 4  ;;  %p240_p0 = scmp.ne.s32.totalorder %s394_s1, %s239_s19  ;;  %s22_s16 = int_to_ptr.vmem [resolvable:$true] %s21_s16 }
   0x4   :  { %p243_p1 = scmp.lt.u32.totalorder %s239_s19, %s394_s1 }
   0x6   :  { %p245_p2 = pnand %p243_p1, %p240_p0 }
   0x8   :  { %248 = shalt.err (!%p245_p2)
}
   0x9   :  { %s249_s24 = scalar_lea.vmem %s22_s16, 128  ;;  %p254_p4 = scmp.lt.s32.totalorder %s22_s16, %s22_s16 }
   0xa   :  { %p250_p3 = scmp.ne.s32.totalorder %s22_s16, %s249_s24  ;;  %p255_p5 = scmp.lt.s32.totalorder %s249_s24, %s249_s24 }
   0xc   :  { %p256_p6 = por %p255_p5, %p254_p4 }
   0xe   :  { %p257_p7 = pnand %p256_p6, %p250_p3 }
  0x10   :  { %260 = shalt.err (!%p257_p7)
}
  0x11   :  { %24 = dma.hbm_to_vmem [thread:$0]  %s394_s1, 128, %s22_s16, [#allocation3]  }
  0x12   :  { %305 = dma.done.wait [#allocation3], 128  }
  0x13   :  { %306 = vsyncadd [#allocation3], 4294967168  ;;  %v312_v0 = vmov 0.0   ;;  %vm313_vm0 = vmmov 0   ;;  %v314_v1 = vmov 0   ;;  %vm38_vm1 = vcmask 261120  }
  0x14   :  { %219 = vmatprep.subr.mxu0 %v312_v0  ;;  %221 = vmatprep.mubr.msk.f32.mxu0 %vm313_vm0, %v312_v0  ;;  %v30_v2 = vld [vmem:[%s393_s0] sm:$0xff]  ;;  %vm115_vm2 = vcmask 64512   ;;  %v137_v13 = vlaneseq  ;;  %s315_s0 = smov [#allocation5]   ;;  %vm180_vm11 = vcmask 1040384   ;;  %vm182_vm13 = vcmask 58368  }
  0x15   :  { %230 = vset.pattern.permute.xlu0 %v314_v1  ;;  %v32_v3 = vld [vmem:[%s395_s2] sm:$0xff]  ;;  %220 = vmatpush3.xpose.msk.msra.mxu0 %vm38_vm1, %v30_v2  ;;  %s192_s1 = sshll.u32 %s315_s0, 4  ;;  %s316_s2 = smov [#allocation6]   ;;  %s193_s1 = int_to_ptr.vmem [resolvable:$true] %s192_s1 }
  0x16   :  { %v31_v4 = vld [vmem:[#allocation2] sm:$0xff]  ;;  %35 = vperm.xlu0 %230, %v32_v3   ;;  %v138_v16 = vshrl.u32 %v137_v13, 7  ;;  %s202_s5 = sshll.u32 %s316_s2, 4  ;;  %s261_s6 = scalar_lea.vmem %s193_s1, 32  ;;  %s203_s5 = int_to_ptr.vmem [resolvable:$true] %s202_s5 }
  0x17   :  { %p262_p8 = scmp.ne.s32.totalorder %s193_s1, %s261_s6  ;;  %p266_p9 = scmp.lt.s32.totalorder %s193_s1, %s193_s1 }
  0x18   :  { %222 = vmatmul.mubr.msk.f32.vlgmr.msra.gmra.mrb[0].mxu0 %vm38_vm1, %v31_v4  ;;  %p267_p10 = scmp.lt.s32.totalorder %s261_s6, %s261_s6 }
  0x1a   :  { %p268_p11 = por %p267_p10, %p266_p9 }
  0x1c   :  { %p269_p12 = pnand %p268_p11, %p262_p8 }
  0x95   :  { %v36_v5 = vpop.permute.xlu0 %35 }
  0xeb   :  { %v111_v6 = vpop.f32.mrb[0].mxu0 }
  0xec   :  { %v112_v7 = vadd.f32 %v111_v6, %v36_v5  ;;  %v223_v8 = vpop.f32.mrb[1].mxu0 }
  0xee   :  { %v116_v9 = vsel %vm115_vm2, %v112_v7, -inf }
  0xef   :  { %v117_v10 = vrot.slane %v116_v9, 4 }
  0xf1   :  { %v118_v11 = vmax.f32 %v116_v9, %v117_v10 }
  0xf3   :  { %v119_v12 = vrot.slane %v118_v11, 2 }
  0xf5   :  { %v120_v14 = vmax.f32 %v118_v11, %v119_v12 }
  0xf7   :  { %v121_v15 = vrot.slane %v120_v14, 1 }
  0xf9   :  { %v122_v17 = vmax.f32 %v120_v14, %v121_v15 }
  0xfb   :  { %v123_v18 = vsub.f32 %v112_v7, %v122_v17  ;;  %vm139_vm3 = vcmp.eq.f32.partialorder %v112_v7, %v122_v17  ;;  %v151_v41 = vsub.f32 %v122_v17, %v122_v17 }
  0xfc   :  { %v140_v19 = vsel %vm139_vm3, %v138_v16, 8 }
  0xfd   :  { %v124_v20 = vmul.f32 1.442695, %v123_v18  ;;  %v141_v21 = vsel %vm115_vm2, %v140_v19, 2147483647  ;;  %v152_v45 = vmul.f32 1.442695, %v151_v41 }
  0xfe   :  { %v142_v22 = vrot.slane %v141_v21, 4 }
  0xff   :  { %231 = vpow2.f32 %v124_v20 }
 0x100   :  { %vm143_vm4 = vcmp.lt.s32.totalorder %v141_v21, %v142_v22 }
 0x101   :  { %v144_v23 = vsel %vm143_vm4, %v141_v21, %v142_v22 }
 0x102   :  { %v145_v24 = vrot.slane %v144_v23, 2 }
 0x104   :  { %vm146_vm5 = vcmp.lt.s32.totalorder %v144_v23, %v145_v24 }
 0x105   :  { %v147_v25 = vsel %vm146_vm5, %v144_v23, %v145_v24 }
 0x106   :  { %v148_v26 = vrot.slane %v147_v25, 1 }
 0x108   :  { %vm149_vm6 = vcmp.lt.s32.totalorder %v147_v25, %v148_v26 }
 0x109   :  { %v232_v27 = vpop.eup %231  ;;  %v150_v28 = vsel %vm149_vm6, %v147_v25, %v148_v26 }
 0x10a   :  { %vm155_vm7 = vcmp.eq.s32.totalorder %v138_v16, %v150_v28  ;;  %v126_v29 = vsel %vm115_vm2, %v232_v27, 0.0 }
 0x10b   :  { %v156_v30 = vsel %vm155_vm7, -inf, %v112_v7  ;;  %v127_v31 = vrot.slane %v126_v29, 4 }
 0x10c   :  { %v157_v32 = vsel %vm115_vm2, %v156_v30, -inf }
 0x10d   :  { %v158_v33 = vrot.slane %v157_v32, 4  ;;  %v128_v34 = vadd.f32 %v127_v31, %v126_v29 }
 0x10f   :  { %v159_v35 = vmax.f32 %v157_v32, %v158_v33  ;;  %v129_v36 = vrot.slane %v128_v34, 2 }
 0x111   :  { %v160_v37 = vrot.slane %v159_v35, 2  ;;  %v130_v38 = vadd.f32 %v129_v36, %v128_v34 }
 0x113   :  { %v161_v39 = vmax.f32 %v159_v35, %v160_v37  ;;  %v131_v40 = vrot.slane %v130_v38, 1 }
 0x115   :  { %v162_v42 = vrot.slane %v161_v39, 1  ;;  %v132_v43 = vadd.f32 %v131_v40, %v130_v38 }
 0x117   :  { %v163_v44 = vmax.f32 %v161_v39, %v162_v42  ;;  %233 = vrcp.f32 %v132_v43 }
 0x118   :  { %235 = vpow2.f32 %v152_v45 }
 0x119   :  { %vm164_vm8 = vcmp.eq.f32.partialorder %v156_v30, %v163_v44  ;;  %v176_v46 = vsub.f32 %v163_v44, %v122_v17 }
 0x11a   :  { %v165_v47 = vsel %vm164_vm8, %v138_v16, 8 }
 0x11b   :  { %v166_v48 = vsel %vm115_vm2, %v165_v47, 2147483647  ;;  %v177_v49 = vmul.f32 1.442695, %v176_v46 }
 0x11c   :  { %v167_v50 = vrot.slane %v166_v48, 4 }
 0x11d   :  { %237 = vpow2.f32 %v177_v49 }
 0x11e   :  { %vm168_vm9 = vcmp.lt.s32.totalorder %v166_v48, %v167_v50 }
 0x11f   :  { %v169_v51 = vsel %vm168_vm9, %v166_v48, %v167_v50 }
 0x120   :  { %v170_v52 = vrot.slane %v169_v51, 2 }
 0x121   :  { %v234_v53 = vpop.eup %233 }
 0x122   :  { %vm171_vm10 = vcmp.lt.s32.totalorder %v169_v51, %v170_v52  ;;  %v134_v54 = vmul.f32 %v234_v53, %v132_v43  ;;  %v236_v58 = vpop.eup %235 }
 0x123   :  { %v172_v55 = vsel %vm171_vm10, %v169_v51, %v170_v52 }
 0x124   :  { %v173_v56 = vrot.slane %v172_v55, 1  ;;  %v135_v57 = vsub.f32 2.0, %v134_v54 }
 0x126   :  { %vm174_vm12 = vcmp.lt.s32.totalorder %v172_v55, %v173_v56  ;;  %v136_v59 = vmul.f32 %v234_v53, %v135_v57 }
 0x127   :  { %v238_v60 = vpop.eup %237  ;;  %v175_v61 = vsel %vm174_vm12, %v172_v55, %v173_v56 }
 0x128   :  { %v184_v62 = vsel %vm180_vm11, %v150_v28, %v175_v61  ;;  %v154_v63 = vmul.f32 %v236_v58, %v136_v59  ;;  %v179_v0 = vmul.f32 %v238_v60, %v136_v59 }
 0x129   :  { %185 = vst.msk [vmem:[#allocation5] sm:$0x3] %vm182_vm13, %v184_v62 }
 0x12a   :  { %272 = shalt.err (!%p269_p12)
}
 0x12b   :  { %s273_s9 = scalar_lea.hbm %s396_s3, 32 }
 0x12c   :  { %p274_p13 = scmp.ne.s32.totalorder %s396_s3, %s273_s9  ;;  %p277_p0 = scmp.lt.u32.totalorder %s273_s9, %s396_s3 }
 0x12e   :  { %p279_p1 = pnand %p277_p0, %p274_p13 }
 0x130   :  { %282 = shalt.err (!%p279_p1)
}
 0x131   :  { %195 = dma.vmem_to_hbm [thread:$0]  %s193_s1, 32, %s396_s3, [#allocation4]   ;;  %v181_v1 = vsel %vm180_vm11, %v154_v63, %v179_v0 }
 0x132   :  { %183 = vst.msk [vmem:[#allocation6] sm:$0x3] %vm182_vm13, %v181_v1  ;;  %s283_s16 = scalar_lea.vmem %s203_s5, 32  ;;  %p288_p3 = scmp.lt.s32.totalorder %s203_s5, %s203_s5 }
 0x133   :  { %p284_p2 = scmp.ne.s32.totalorder %s203_s5, %s283_s16  ;;  %p289_p4 = scmp.lt.s32.totalorder %s283_s16, %s283_s16 }
 0x135   :  { %p290_p5 = por %p289_p4, %p288_p3 }
 0x137   :  { %p291_p6 = pnand %p290_p5, %p284_p2 }
 0x139   :  { %294 = shalt.err (!%p291_p6)
}
 0x13a   :  { %s295_s19 = scalar_lea.hbm %s397_s4, 32 }
 0x13b   :  { %p296_p7 = scmp.ne.s32.totalorder %s397_s4, %s295_s19  ;;  %p299_p8 = scmp.lt.u32.totalorder %s295_s19, %s397_s4 }
 0x13d   :  { %p301_p9 = pnand %p299_p8, %p296_p7 }
 0x13f   :  { %304 = shalt.err (!%p301_p9)
}
 0x140   :  { %205 = dma.vmem_to_hbm [thread:$0]  %s203_s5, 32, %s397_s4, [#allocation7]  }
 0x141   :  { %307 = dma.done.wait [#allocation4], 32  }
 0x142   :  { %308 = vsyncadd [#allocation4], 4294967264 }
 0x143   :  { %309 = dma.done.wait [#allocation7], 32  }
 0x144   :  { %310 = vsyncadd [#allocation7], 4294967264 }
 0x145   :  { %212 = vsyncpa [#allocation3], 1 }
 0x146   :  { %213 = vsyncpa [#allocation4], 1 }
 0x147   :  { %214 = vsyncpa [#allocation7], 1 }

</bundles_post_ra>
